<compile_context>
chip_gen: v6e
topology: v6e:2x2x1
jax: 0.10.0
libtpu: 0.0.40
codegen_flags: <defaults>
</compile_context>

<pallas_src>
import jax
import jax.numpy as jnp
from jax.experimental import pallas as pl
from jax.experimental.pallas import tpu as pltpu

_LANE = 128
_SUBLANE = 8


def _round_up(n, m):
    return ((n + m - 1) // m) * m


def _mlp_decoder_kernel(
    x_ref,                  # (TN, D_in)            f32  (cast to bf16 in-kernel)
    w1_ref, c1_ref,         # (D_in, Hp)  bf16, (1, Hp)   f32   -- fc1 + BN1 + bias folded
    w2_ref, c2_ref,         # (Hp, Hp)    bf16, (1, Hp)   f32   -- fc2 + BN2 + bias folded
    w3_ref, c3_ref,         # (Hp, Opad)  bf16, (1, Opad) f32   -- fc3 + bias
    o_ref,                  # (Orows, TN) f32  -- compact, transposed (batch on lanes)
):
    # bf16 cast happens here (not in the wrapper) so x crosses HBM exactly once.
    x = x_ref[...].astype(jnp.bfloat16)

    # fc1 (+ folded BN1 + bias) -> relu.  Dropout is identity at inference.
    h = jnp.dot(x, w1_ref[...], preferred_element_type=jnp.float32) + c1_ref[...]
    h = jnp.maximum(h, 0.0)

    # fc2 (+ folded BN2 + bias) -> relu
    h = jnp.dot(h.astype(jnp.bfloat16), w2_ref[...],
                preferred_element_type=jnp.float32) + c2_ref[...]
    h = jnp.maximum(h, 0.0)

    # fc3 (columns zero-padded to a lane-dense multiple of 128 for the MXU)
    y = jnp.dot(h.astype(jnp.bfloat16), w3_ref[...],
                preferred_element_type=jnp.float32) + c3_ref[...]

    # Compact transposed store: only the first `o_ref.shape[0]` rows of the
    # transposed result carry real logits.  The transpose runs on the (idle)
    # XLU; the store is lane-dense along the batch axis.
    o_ref[...] = y.T[: o_ref.shape[0], :].astype(o_ref.dtype)


def prepare_params(p, eps=1e-5):
    """Fold BatchNorm1d (eval/running stats) + Linear bias into the weights,
    and zero-pad the hidden / output feature dims to lane-dense multiples.

    bn(z) = z*s + t,  s = gamma/sqrt(var+eps),  t = beta - mean*s
    =>  relu(bn(x@w + b)) == relu(x @ (w*s) + (b*s + t))
    Padded hidden units get zero weights and zero bias, so they stay exactly
    zero through relu and contribute nothing downstream.
    """
    s1 = p["gamma1"] / jnp.sqrt(p["var1"] + eps)
    t1 = p["beta1"] - p["mean1"] * s1
    s2 = p["gamma2"] / jnp.sqrt(p["var2"] + eps)
    t2 = p["beta2"] - p["mean2"] * s2

    in_dim, hidden = p["w1"].shape
    binary = p["w3"].shape[1]
    hid_pad = _round_up(hidden, _LANE)
    out_cols = _round_up(binary, _LANE)

    w1 = jnp.zeros((in_dim, hid_pad), jnp.float32).at[:, :hidden].set(p["w1"] * s1[None, :])
    c1 = jnp.zeros((hid_pad,), jnp.float32).at[:hidden].set(p["b1"] * s1 + t1)
    w2 = jnp.zeros((hid_pad, hid_pad), jnp.float32).at[:hidden, :hidden].set(p["w2"] * s2[None, :])
    c2 = jnp.zeros((hid_pad,), jnp.float32).at[:hidden].set(p["b2"] * s2 + t2)
    w3 = jnp.zeros((hid_pad, out_cols), jnp.float32).at[:hidden, :binary].set(p["w3"])
    c3 = jnp.zeros((out_cols,), jnp.float32).at[:binary].set(p["b3"])

    return dict(
        w1=w1.astype(jnp.bfloat16), c1=c1.reshape(1, -1).astype(jnp.float32),
        w2=w2.astype(jnp.bfloat16), c2=c2.reshape(1, -1).astype(jnp.float32),
        w3=w3.astype(jnp.bfloat16), c3=c3.reshape(1, -1).astype(jnp.float32),
        binary=binary,
    )


def _choose_tile(n, tile_n):
    """Pick a batch tile: multiple of 128 (lane-dense transposed output),
    large enough to amortize per-grid-step overhead, but capped so the
    'parallel' batch axis keeps >= 2 steps when N is large (v7x megacore)."""
    t = min(tile_n, _round_up(n, _LANE))
    if n > _LANE:
        t = min(t, _round_up(pl.cdiv(n, 2), _LANE))
    return max(_LANE, _round_up(t, _LANE))


def mlp_decoder_forward(x, prep, *, tile_n=2048):
    """Runs the fused MLPDecoder kernel.

    x: (N, in_dim) float32.  Returns (N, binary) float32.
    """
    N, in_dim = x.shape
    hid_pad = prep["w1"].shape[1]
    out_cols = prep["w3"].shape[1]
    binary = prep["binary"]
    out_rows = _round_up(binary, _SUBLANE)

    tile = _choose_tile(N, tile_n)
    num_blocks = pl.cdiv(N, tile)
    n_total = num_blocks * tile          # output slab padded to full blocks
    grid = (num_blocks,)

    # VMEM budget: double-buffered x tiles + output slab, single-resident
    # (constant index_map) weights still get 2 buffers, plus f32 intermediates.
    weight_bytes = 2 * ((in_dim * hid_pad + hid_pad * hid_pad + hid_pad * out_cols) * 2
                        + (2 * hid_pad + out_cols) * 4)
    act_bytes = 2 * (tile * in_dim * 4 + out_rows * tile * 4)
    scratch_bytes = 3 * tile * max(hid_pad, out_cols) * 4
    vmem_limit = int(min(max(weight_bytes + act_bytes + scratch_bytes + (4 << 20),
                             32 << 20), 100 << 20))

    # Parameters are small and use constant index_maps, so each block is
    # DMA'd once and stays resident in VMEM across the batch grid.
    full = lambda shape: pl.BlockSpec(shape, lambda i: (0, 0))

    in_specs = [
        pl.BlockSpec((tile, in_dim), lambda i: (i, 0)),
        full((in_dim, hid_pad)), full((1, hid_pad)),
        full((hid_pad, hid_pad)), full((1, hid_pad)),
        full((hid_pad, out_cols)), full((1, out_cols)),
    ]
    # Compact transposed output: batch on the lane axis, one block column per step.
    out_spec = pl.BlockSpec((out_rows, tile), lambda i: (0, i))

    y = pl.pallas_call(
        _mlp_decoder_kernel,
        out_shape=jax.ShapeDtypeStruct((out_rows, n_total), jnp.float32),
        grid_spec=pltpu.PrefetchScalarGridSpec(
            num_scalar_prefetch=0,
            grid=grid,
            in_specs=in_specs,
            out_specs=out_spec,
        ),
        compiler_params=pltpu.CompilerParams(
            dimension_semantics=("parallel",),   # batch axis shards across TCs on v7x
            vmem_limit_bytes=vmem_limit,
        ),
    )(x, prep["w1"], prep["c1"], prep["w2"], prep["c2"], prep["w3"], prep["c3"])

    # Undo the in-kernel transpose and drop padded rows/columns.
    return y[:binary, :N].T


def make_params(key, in_dim, hidden, binary=2):
    """Deterministic synthetic parameters (mirrors nn.Linear / nn.BatchNorm1d shapes)."""
    ks = jax.random.split(key, 8)
    # Linear weights stored pre-transposed: (in_features, out_features).
    w1 = jax.random.normal(ks[0], (in_dim, hidden), jnp.float32) * 0.1
    b1 = jax.random.normal(ks[1], (hidden,), jnp.float32) * 0.1
    w2 = jax.random.normal(ks[2], (hidden, hidden), jnp.float32) * 0.1
    b2 = jax.random.normal(ks[3], (hidden,), jnp.float32) * 0.1
    w3 = jax.random.normal(ks[4], (hidden, binary), jnp.float32) * 0.1
    b3 = jax.random.normal(ks[5], (binary,), jnp.float32) * 0.1

    # BatchNorm1d parameters (eval mode: running stats).
    gamma1 = jnp.ones((hidden,), jnp.float32) * 1.1
    beta1 = jnp.ones((hidden,), jnp.float32) * 0.05
    mean1 = jax.random.normal(ks[6], (hidden,), jnp.float32) * 0.05
    var1 = jnp.abs(jax.random.normal(ks[7], (hidden,), jnp.float32)) * 0.5 + 0.5

    gamma2 = jnp.ones((hidden,), jnp.float32) * 0.9
    beta2 = jnp.ones((hidden,), jnp.float32) * (-0.05)
    mean2 = jnp.linspace(-0.1, 0.1, hidden, dtype=jnp.float32)
    var2 = jnp.linspace(0.5, 1.5, hidden, dtype=jnp.float32)

    return dict(w1=w1, b1=b1, w2=w2, b2=b2, w3=w3, b3=b3,
                gamma1=gamma1, beta1=beta1, mean1=mean1, var1=var1,
                gamma2=gamma2, beta2=beta2, mean2=mean2, var2=var2)


def reference_forward_bf16(x, prep):
    """Pure-JAX reference mirroring the kernel's bf16/f32 precision choices."""
    f32 = lambda a: a.astype(jnp.float32)
    h = f32(x.astype(jnp.bfloat16)) @ f32(prep["w1"]) + prep["c1"]
    h = jnp.maximum(h, 0.0)
    h = f32(h.astype(jnp.bfloat16)) @ f32(prep["w2"]) + prep["c2"]
    h = jnp.maximum(h, 0.0)
    y = f32(h.astype(jnp.bfloat16)) @ f32(prep["w3"]) + prep["c3"]
    return y[:, :prep["binary"]]


def reference_forward_f32(x, p, eps=1e-5):
    """f32-faithful eval-mode reference of the original PyTorch module."""
    h = x @ p["w1"] + p["b1"]
    h = (h - p["mean1"]) / jnp.sqrt(p["var1"] + eps) * p["gamma1"] + p["beta1"]
    h = jnp.maximum(h, 0.0)
    h = h @ p["w2"] + p["b2"]
    h = (h - p["mean2"]) / jnp.sqrt(p["var2"] + eps) * p["gamma2"] + p["beta2"]
    h = jnp.maximum(h, 0.0)
    return h @ p["w3"] + p["b3"]


if __name__ == "__main__":
    key = jax.random.PRNGKey(0)
    kx1, kx2, kp = jax.random.split(key, 3)

    in_dim, hidden, binary = 64, 32, 2
    params = make_params(kp, in_dim, hidden, binary)
    prep = prepare_params(params)

    # Check 1: small batch (single grid step, ragged inside one block).
    N1 = 16
    x1 = jax.random.normal(kx1, (N1, in_dim), jnp.float32)
    out1 = jax.block_until_ready(mlp_decoder_forward(x1, prep))
    assert out1.shape == (N1, binary)
    assert jnp.allclose(out1, reference_forward_bf16(x1, prep), atol=1e-2, rtol=1e-2), \
        "mismatch vs bf16-mirroring reference (N=16)"
    assert jnp.allclose(out1, reference_forward_f32(x1, params), atol=5e-2, rtol=5e-2), \
        "mismatch vs f32-faithful reference (N=16)"

    # Check 2: multi-step parallel grid with a ragged last block (no wrapper pad).
    N2 = 300
    x2 = jax.random.normal(kx2, (N2, in_dim), jnp.float32)
    out2 = jax.block_until_ready(mlp_decoder_forward(x2, prep, tile_n=128))
    assert out2.shape == (N2, binary)
    assert jnp.allclose(out2, reference_forward_bf16(x2, prep), atol=1e-2, rtol=1e-2), \
        "mismatch vs bf16-mirroring reference (N=300)"
    assert jnp.allclose(out2, reference_forward_f32(x2, params), atol=5e-2, rtol=5e-2), \
        "mismatch vs f32-faithful reference (N=300)"

    print("KERNEL_OK")
</pallas_src>

<mosaic_0001>
module attributes {stable_mosaic.version = 11 : i64} {
  func.func @_mlp_decoder_kernel(%arg0: i32, %arg1: memref<128x64xf32, #tpu.memory_space<vmem>>, %arg2: memref<64x128xbf16, #tpu.memory_space<vmem>>, %arg3: memref<1x128xf32, #tpu.memory_space<vmem>>, %arg4: memref<128x128xbf16, #tpu.memory_space<vmem>>, %arg5: memref<1x128xf32, #tpu.memory_space<vmem>>, %arg6: memref<128x128xbf16, #tpu.memory_space<vmem>>, %arg7: memref<1x128xf32, #tpu.memory_space<vmem>>, %arg8: memref<8x128xf32, #tpu.memory_space<vmem>>) attributes {dimension_semantics = [#tpu.dimension_semantics<parallel>], iteration_bounds = array<i64: 1>, scalar_prefetch = 0 : i64, scratch_operands = 0 : i64, tpu.core_type = #tpu.core_type<tc>, window_params = [{transform_indices = @transform_0, window_bounds = array<i64: 128, 64>}, {pipeline_mode = #tpu.pipeline_mode<synchronous>, transform_indices = @transform_1, window_bounds = array<i64: 64, 128>}, {pipeline_mode = #tpu.pipeline_mode<synchronous>, transform_indices = @transform_2, window_bounds = array<i64: 1, 128>}, {pipeline_mode = #tpu.pipeline_mode<synchronous>, transform_indices = @transform_3, window_bounds = array<i64: 128, 128>}, {pipeline_mode = #tpu.pipeline_mode<synchronous>, transform_indices = @transform_4, window_bounds = array<i64: 1, 128>}, {pipeline_mode = #tpu.pipeline_mode<synchronous>, transform_indices = @transform_5, window_bounds = array<i64: 128, 128>}, {pipeline_mode = #tpu.pipeline_mode<synchronous>, transform_indices = @transform_6, window_bounds = array<i64: 1, 128>}, {transform_indices = @transform_7, window_bounds = array<i64: 8, 128>}]} {
    %c0 = arith.constant 0 : index
    %c0_0 = arith.constant 0 : index
    %0 = vector.load %arg1[%c0, %c0_0] : memref<128x64xf32, #tpu.memory_space<vmem>>, vector<128x64xf32>
    %1 = arith.truncf %0 : vector<128x64xf32> to vector<128x64xbf16>
    %c0_1 = arith.constant 0 : index
    %c0_2 = arith.constant 0 : index
    %2 = vector.load %arg2[%c0_1, %c0_2] : memref<64x128xbf16, #tpu.memory_space<vmem>>, vector<64x128xbf16>
    %cst = arith.constant dense<0.000000e+00> : vector<128x128xf32>
    %3 = tpu.matmul %1, %2, %cst {dimension_numbers = #tpu.dot_dimension_numbers<[1], [0], [0], [1], [0, 0, 1, 1], [], []>} : vector<128x64xbf16>, vector<64x128xbf16>, vector<128x128xf32> -> vector<128x128xf32>
    %c0_3 = arith.constant 0 : index
    %c0_4 = arith.constant 0 : index
    %4 = vector.load %arg3[%c0_3, %c0_4] : memref<1x128xf32, #tpu.memory_space<vmem>>, vector<1x128xf32>
    %5 = vector.broadcast %4 : vector<1x128xf32> to vector<128x128xf32>
    %6 = arith.addf %3, %5 : vector<128x128xf32>
    %cst_5 = arith.constant 0.000000e+00 : f32
    %7 = vector.broadcast %cst_5 : f32 to vector<128x128xf32>
    %8 = arith.maximumf %6, %7 : vector<128x128xf32>
    %9 = arith.truncf %8 : vector<128x128xf32> to vector<128x128xbf16>
    %c0_6 = arith.constant 0 : index
    %c0_7 = arith.constant 0 : index
    %10 = vector.load %arg4[%c0_6, %c0_7] : memref<128x128xbf16, #tpu.memory_space<vmem>>, vector<128x128xbf16>
    %cst_8 = arith.constant dense<0.000000e+00> : vector<128x128xf32>
    %11 = tpu.matmul %9, %10, %cst_8 {dimension_numbers = #tpu.dot_dimension_numbers<[1], [0], [0], [1], [0, 0, 1, 1], [], []>} : vector<128x128xbf16>, vector<128x128xbf16>, vector<128x128xf32> -> vector<128x128xf32>
    %c0_9 = arith.constant 0 : index
    %c0_10 = arith.constant 0 : index
    %12 = vector.load %arg5[%c0_9, %c0_10] : memref<1x128xf32, #tpu.memory_space<vmem>>, vector<1x128xf32>
    %13 = vector.broadcast %12 : vector<1x128xf32> to vector<128x128xf32>
    %14 = arith.addf %11, %13 : vector<128x128xf32>
    %cst_11 = arith.constant 0.000000e+00 : f32
    %15 = vector.broadcast %cst_11 : f32 to vector<128x128xf32>
    %16 = arith.maximumf %14, %15 : vector<128x128xf32>
    %17 = arith.truncf %16 : vector<128x128xf32> to vector<128x128xbf16>
    %c0_12 = arith.constant 0 : index
    %c0_13 = arith.constant 0 : index
    %18 = vector.load %arg6[%c0_12, %c0_13] : memref<128x128xbf16, #tpu.memory_space<vmem>>, vector<128x128xbf16>
    %cst_14 = arith.constant dense<0.000000e+00> : vector<128x128xf32>
    %19 = tpu.matmul %17, %18, %cst_14 {dimension_numbers = #tpu.dot_dimension_numbers<[1], [0], [0], [1], [0, 0, 1, 1], [], []>} : vector<128x128xbf16>, vector<128x128xbf16>, vector<128x128xf32> -> vector<128x128xf32>
    %c0_15 = arith.constant 0 : index
    %c0_16 = arith.constant 0 : index
    %20 = vector.load %arg7[%c0_15, %c0_16] : memref<1x128xf32, #tpu.memory_space<vmem>>, vector<1x128xf32>
    %21 = vector.broadcast %20 : vector<1x128xf32> to vector<128x128xf32>
    %22 = arith.addf %19, %21 : vector<128x128xf32>
    %23 = tpu.transpose %22, [1, 0] : vector<128x128xf32> -> vector<128x128xf32>
    %24 = vector.extract_strided_slice %23 {offsets = [0, 0], sizes = [8, 128], strides = [1, 1]} : vector<128x128xf32> to vector<8x128xf32>
    %c0_17 = arith.constant 0 : index
    %c0_18 = arith.constant 0 : index
    %25 = vector.load %arg8[%c0_17, %c0_18] : memref<8x128xf32, #tpu.memory_space<vmem>>, vector<8x128xf32>
    tpu.vector_store %arg8[%c0_17, %c0_18], %24 {strides = array<i32>} : memref<8x128xf32, #tpu.memory_space<vmem>>, vector<8x128xf32>,
    return
  }
  func.func @transform_0(%arg0: i32) -> (i32, i32) {
    %c0_i32 = arith.constant 0 : i32
    %c0_i32_0 = arith.constant 0 : i32
    return %arg0, %c0_i32 : i32, i32
  }
  func.func @transform_1(%arg0: i32) -> (i32, i32) {
    %c0_i32 = arith.constant 0 : i32
    %c0_i32_0 = arith.constant 0 : i32
    %c0_i32_1 = arith.constant 0 : i32
    return %c0_i32, %c0_i32_0 : i32, i32
  }
  func.func @transform_2(%arg0: i32) -> (i32, i32) {
    %c0_i32 = arith.constant 0 : i32
    %c0_i32_0 = arith.constant 0 : i32
    %c0_i32_1 = arith.constant 0 : i32
    return %c0_i32, %c0_i32_0 : i32, i32
  }
  func.func @transform_3(%arg0: i32) -> (i32, i32) {
    %c0_i32 = arith.constant 0 : i32
    %c0_i32_0 = arith.constant 0 : i32
    %c0_i32_1 = arith.constant 0 : i32
    return %c0_i32, %c0_i32_0 : i32, i32
  }
  func.func @transform_4(%arg0: i32) -> (i32, i32) {
    %c0_i32 = arith.constant 0 : i32
    %c0_i32_0 = arith.constant 0 : i32
    %c0_i32_1 = arith.constant 0 : i32
    return %c0_i32, %c0_i32_0 : i32, i32
  }
  func.func @transform_5(%arg0: i32) -> (i32, i32) {
    %c0_i32 = arith.constant 0 : i32
    %c0_i32_0 = arith.constant 0 : i32
    %c0_i32_1 = arith.constant 0 : i32
    return %c0_i32, %c0_i32_0 : i32, i32
  }
  func.func @transform_6(%arg0: i32) -> (i32, i32) {
    %c0_i32 = arith.constant 0 : i32
    %c0_i32_0 = arith.constant 0 : i32
    %c0_i32_1 = arith.constant 0 : i32
    return %c0_i32, %c0_i32_0 : i32, i32
  }
  func.func @transform_7(%arg0: i32) -> (i32, i32) {
    %c0_i32 = arith.constant 0 : i32
    %c0_i32_0 = arith.constant 0 : i32
    return %c0_i32, %arg0 : i32, i32
  }
}

</mosaic_0001>

<bundles_post_ra>
// kernel: tpu_custom_call.1
= control target key start
LH: loop header
LB: loop body
LE: loop exit
PB: predicated region body
PF: predicated region fallthrough
CT: control target
= control target key end

     0   :  { %12 = vsyncpa [#allocation3], 0  ;;  %s1138_s0 = inlined_call_operand.hbm [shape: f32[16,64], index: 0, kind: input, shape index: {}]   ;;  %s1139_s1 = inlined_call_operand.hbm [shape: bf16[64,128], index: 1, kind: input, shape index: {}]   ;;  %s1140_s2 = inlined_call_operand.vmem [shape: f32[1,128], index: 2, kind: input, shape index: {}]   ;;  %s1141_s3 = inlined_call_operand.hbm [shape: bf16[128,128], index: 3, kind: input, shape index: {}]   ;;  %s1142_s4 = inlined_call_operand.vmem [shape: f32[1,128], index: 4, kind: input, shape index: {}]   ;;  %s1143_s5 = inlined_call_operand.hbm [shape: bf16[128,128], index: 5, kind: input, shape index: {}]   ;;  %s1144_s6 = inlined_call_operand.vmem [shape: f32[1,128], index: 6, kind: input, shape index: {}]   ;;  %s1145_s7 = inlined_call_operand.hbm [shape: f32[8,128], index: 7, kind: output, shape index: {}]  }
   0x1   :  { %13 = vsyncpa [#allocation6], 0 }
   0x2   :  { %14 = vsyncpa [#allocation9], 0 }
   0x3   :  { %15 = vsyncpa [#allocation4], 0 }
   0x4   :  { %20 = vsyncadd [#allocation3], 1792  ;;  %s1018_s24 = smov [#allocation5]  }
   0x5   :  { %s33_s25 = sshll.u32 %s1018_s24, 4  ;;  %s34_s25 = int_to_ptr.vmem [resolvable:$true] %s33_s25 }
   0x6   :  { %s918_s26 = scalar_lea.vmem %s34_s25, 512  ;;  %p923_p1 = scmp.lt.s32.totalorder %s34_s25, %s34_s25 }
   0x7   :  { %p919_p0 = scmp.ne.s32.totalorder %s34_s25, %s918_s26  ;;  %p924_p2 = scmp.lt.s32.totalorder %s918_s26, %s918_s26 }
   0x9   :  { %p925_p3 = por %p924_p2, %p923_p1 }
   0xb   :  { %p926_p4 = pnand %p925_p3, %p919_p0 }
   0xd   :  { %929 = shalt.err (!%p926_p4)
}
   0xe   :  { %s1019_s27 = smov 64   ;;  %s1020_s28 = smov 4  }
   0xf   :  { %39 = dma.hbm_to_vmem [thread:$0]  %s1139_s1, 512, %s34_s25, [#allocation6], %s1019_s27, %s1019_s27, %s1020_s28  }
  0x10   :  { %s1021_s8 = smov [#allocation2]  }
  0x11   :  { %s21_s9 = sshll.u32 %s1021_s8, 4  ;;  %s22_s9 = int_to_ptr.vmem [resolvable:$true] %s21_s9 }
  0x12   :  { %s938_s10 = scalar_lea.vmem %s22_s9, 256  ;;  %s942_s11 = scalar_lea.vmem %s22_s9, 2048 }
  0x13   :  { %p939_p5 = scmp.ne.s32.totalorder %s22_s9, %s938_s10  ;;  %p943_p6 = scmp.lt.s32.totalorder %s22_s9, %s22_s9 }
  0x14   :  { %p944_p7 = scmp.lt.s32.totalorder %s942_s11, %s938_s10 }
  0x16   :  { %p945_p8 = por %p944_p7, %p943_p6 }
  0x18   :  { %p946_p9 = pnand %p945_p8, %p939_p5 }
  0x1a   :  { %949 = shalt.err (!%p946_p9)
}
  0x1b   :  { %s1022_s12 = smov 128   ;;  %s1023_s13 = smov 8  }
  0x1c   :  { %27 = dma.hbm_to_vmem [thread:$0]  %s1138_s0, 256, %s22_s9, [#allocation3], %s1022_s12, %s1022_s12, %s1023_s13  }
  0x1d   :  { %s1024_s16 = smov [#allocation7]   ;;  %s1025_s1 = smov [#allocation8]  }
  0x1e   :  { %s47_s17 = sshll.u32 %s1024_s16, 4  ;;  %s61_s18 = sshll.u32 %s1025_s1, 4  ;;  %s48_s17 = int_to_ptr.vmem [resolvable:$true] %s47_s17  ;;  %s62_s18 = int_to_ptr.vmem [resolvable:$true] %s61_s18 }
  0x1f   :  { %s958_s19 = scalar_lea.vmem %s48_s17, 1024  ;;  %p963_p11 = scmp.lt.s32.totalorder %s48_s17, %s48_s17 }
  0x20   :  { %p959_p10 = scmp.ne.s32.totalorder %s48_s17, %s958_s19  ;;  %p964_p12 = scmp.lt.s32.totalorder %s958_s19, %s958_s19 }
  0x22   :  { %p965_p13 = por %p964_p12, %p963_p11 }
  0x24   :  { %p966_p0 = pnand %p965_p13, %p959_p10 }
  0x26   :  { %969 = shalt.err (!%p966_p0)
}
  0x27   :  { %53 = dma.hbm_to_vmem [thread:$0]  %s1141_s3, 1024, %s48_s17, [#allocation6], %s1019_s27, %s1019_s27, %s1020_s28  }
  0x28   :  { %s978_s0 = scalar_lea.vmem %s62_s18, 1024  ;;  %p983_p2 = scmp.lt.s32.totalorder %s62_s18, %s62_s18 }
  0x29   :  { %p979_p1 = scmp.ne.s32.totalorder %s62_s18, %s978_s0  ;;  %p984_p3 = scmp.lt.s32.totalorder %s978_s0, %s978_s0 }
  0x2b   :  { %p985_p4 = por %p984_p3, %p983_p2 }
  0x2d   :  { %p986_p5 = pnand %p985_p4, %p979_p1 }
  0x2f   :  { %989 = shalt.err (!%p986_p5)
}
  0x30   :  { %67 = dma.hbm_to_vmem [thread:$0]  %s1143_s5, 1024, %s62_s18, [#allocation9], %s1019_s27, %s1019_s27, %s1020_s28  }
  0x31   :  { %1010 = dma.done.wait [#allocation3], 2048  }
  0x32   :  { %1011 = vsyncadd [#allocation3], 4294965248 }
  0x33   :  { %1012 = dma.done.wait [#allocation6], 1536  }
  0x34   :  { %1013 = vsyncadd [#allocation6], 4294965760 }
  0x35   :  { %1014 = dma.done.wait [#allocation9], 1024  }
  0x36   :  { %1015 = vsyncadd [#allocation9], 4294966272  ;;  %v890_v0 = vld [vmem:[#allocation5 + $0x18] sm:$0xff]   ;;  %v891_v1 = vld [vmem:[#allocation5 + $0x10] sm:$0xff]   ;;  %vm146_vm0 = vcmask 523264  }
  0x37   :  { %777 = vmatprep.subr.bf16.mxu0 %v890_v0  ;;  %v892_v2 = vld [vmem:[#allocation5 + $0x8] sm:$0xff]   ;;  %v83_v3 = vld [vmem:[#allocation2] sm:$0xff]  ;;  %v85_v7 = vld [vmem:[#allocation2 + $0x10] sm:$0xff] }
  0x38   :  { %778 = vmatpush3.bf16.msra.mxu0 %v890_v0  ;;  %v84_v4 = vld [vmem:[#allocation2 + $0x8] sm:$0xff]  ;;  %v893_v6 = vld [vmem:[#allocation5] sm:$0xff]   ;;  %v86_v8 = vld [vmem:[#allocation2 + $0x18] sm:$0xff] }
  0x39   :  { %779 = vmatprep.subr.bf16.mxu0 %v891_v1  ;;  %v99_v5 = vpack.c.bf16 %v84_v4, %v83_v3  ;;  %v87_v9 = vld [vmem:[#allocation2 + $0x20] sm:$0xff]  ;;  %v894_v10 = vld [vmem:[#allocation7 + $0x38] sm:$0xff]   ;;  %v895_v11 = vld [vmem:[#allocation7 + $0x30] sm:$0xff]   ;;  %v100_v13 = vpack.c.bf16 %v86_v8, %v85_v7 }
  0x3a   :  { %v88_v12 = vld [vmem:[#allocation2 + $0x28] sm:$0xff]  ;;  %801 = vmatprep.subr.bf16.mxu1 %v894_v10  ;;  %v897_v16 = vld [vmem:[#allocation7 + $0x20] sm:$0xff]   ;;  %v89_v17 = vld [vmem:[#allocation2 + $0x30] sm:$0xff] }
  0x3b   :  { %785 = vmatprep.mubr.msk.bf16.mxu0 %vm146_vm0, %v99_v5  ;;  %802 = vmatpush3.bf16.msra.mxu1 %v894_v10  ;;  %v896_v14 = vld [vmem:[#allocation7 + $0x28] sm:$0xff]   ;;  %v101_v15 = vpack.c.bf16 %v88_v12, %v87_v9  ;;  %v90_v18 = vld [vmem:[#allocation2 + $0x38] sm:$0xff]  ;;  %v91_v19 = vld [vmem:[#allocation2 + $0x40] sm:$0xff] }
  0x3c   :  { %780 = vmatpush3.bf16.msra.mxu0 %v891_v1  ;;  %803 = vmatprep.subr.bf16.mxu1 %v895_v11  ;;  %v92_v20 = vld [vmem:[#allocation2 + $0x48] sm:$0xff]  ;;  %v102_v21 = vpack.c.bf16 %v90_v18, %v89_v17  ;;  %v898_v22 = vld [vmem:[#allocation7 + $0x18] sm:$0xff]   ;;  %v93_v24 = vld [vmem:[#allocation2 + $0x50] sm:$0xff] }
  0x3d   :  { %781 = vmatprep.subr.bf16.mxu0 %v892_v2  ;;  %v103_v23 = vpack.c.bf16 %v92_v20, %v91_v19  ;;  %v94_v25 = vld [vmem:[#allocation2 + $0x58] sm:$0xff]  ;;  %v95_v26 = vld [vmem:[#allocation2 + $0x60] sm:$0xff]  ;;  %v96_v27 = vld [vmem:[#allocation2 + $0x68] sm:$0xff] }
  0x3e   :  { %v104_v28 = vpack.c.bf16 %v94_v25, %v93_v24  ;;  %v105_v29 = vpack.c.bf16 %v96_v27, %v95_v26  ;;  %v97_v30 = vld [vmem:[#allocation2 + $0x70] sm:$0xff]  ;;  %v98_v31 = vld [vmem:[#allocation2 + $0x78] sm:$0xff]  ;;  %v900_v34 = vld [vmem:[#allocation7 + $0x8] sm:$0xff]  }
  0x3f   :  { %804 = vmatpush3.bf16.msra.mxu1 %v895_v11  ;;  %v106_v32 = vpack.c.bf16 %v98_v31, %v97_v30  ;;  %v899_v33 = vld [vmem:[#allocation7 + $0x10] sm:$0xff]   ;;  %v901_v35 = vld [vmem:[#allocation7] sm:$0xff]   ;;  %v902_v36 = vld [vmem:[#allocation8 + $0x38] sm:$0xff]  }
  0x40   :  { %782 = vmatpush3.bf16.msra.mxu0 %v892_v2  ;;  %805 = vmatprep.subr.bf16.mxu1 %v896_v14  ;;  %v903_v37 = vld [vmem:[#allocation8 + $0x30] sm:$0xff]   ;;  %v904_v38 = vld [vmem:[#allocation8 + $0x28] sm:$0xff]   ;;  %v1096_v39 = vld [vmem:[#allocation8 + $0x20] sm:$0xff]  }
  0x41   :  { %783 = vmatprep.subr.bf16.mxu0 %v893_v6  ;;  %v1099_v40 = vld [vmem:[#allocation8 + $0x18] sm:$0xff]   ;;  %v1107_v43 = vld [vmem:[%s1140_s2] ss:$0 sm:$0xff] }
  0x43   :  { %806 = vmatpush3.bf16.msra.mxu1 %v896_v14 }
  0x44   :  { %784 = vmatpush3.bf16.msra.mxu0 %v893_v6  ;;  %807 = vmatprep.subr.bf16.mxu1 %v897_v16 }
  0x45   :  { %833 = vmatprep.subr.bf16.mxu0 %v902_v36 }
  0x47   :  { %786 = vmatmul.mubr.msk.bf16.vlgmr.msra.gmra.mxu0 %vm146_vm0, %v100_v13  ;;  %808 = vmatpush3.bf16.msra.mxu1 %v897_v16 }
  0x48   :  { %789 = vmatprep.mubr.msk.bf16.mxu0 %vm146_vm0, %v101_v15  ;;  %809 = vmatprep.subr.bf16.mxu1 %v898_v22 }
  0x49   :  { %834 = vmatpush3.bf16.msra.mxu0 %v902_v36 }
  0x4a   :  { %835 = vmatprep.subr.bf16.mxu0 %v903_v37 }
  0x4b   :  { %810 = vmatpush3.bf16.msra.mxu1 %v898_v22 }
  0x4c   :  { %811 = vmatprep.subr.bf16.mxu1 %v899_v33 }
  0x4d   :  { %836 = vmatpush3.bf16.msra.mxu0 %v903_v37 }
  0x4e   :  { %837 = vmatprep.subr.bf16.mxu0 %v904_v38 }
  0x4f   :  { %790 = vmatmul.mubr.msk.bf16.gmra.mxu0 %vm146_vm0, %v102_v21  ;;  %812 = vmatpush3.bf16.msra.mxu1 %v899_v33 }
  0x50   :  { %793 = vmatprep.mubr.msk.bf16.mxu0 %vm146_vm0, %v103_v23  ;;  %813 = vmatprep.subr.bf16.mxu1 %v900_v34 }
  0x51   :  { %838 = vmatpush3.bf16.msra.mxu0 %v904_v38 }
  0x52   :  { %839 = vmatprep.subr.bf16.mxu0 %v1096_v39 }
  0x53   :  { %814 = vmatpush3.bf16.msra.mxu1 %v900_v34  ;;  %v907_v34 = vld [vmem:[#allocation8 + $0x10] sm:$0xff]  }
  0x54   :  { %815 = vmatprep.subr.bf16.mxu1 %v901_v35 }
  0x55   :  { %840 = vmatpush3.bf16.msra.mxu0 %v1096_v39 }
  0x56   :  { %841 = vmatprep.subr.bf16.mxu0 %v1099_v40 }
  0x57   :  { %794 = vmatmul.mubr.msk.bf16.gmra.mxu0 %vm146_vm0, %v104_v28  ;;  %816 = vmatpush3.bf16.msra.mxu1 %v901_v35  ;;  %v908_v35 = vld [vmem:[#allocation8 + $0x8] sm:$0xff]  }
  0x58   :  { %797 = vmatprep.mubr.msk.bf16.mxu0 %vm146_vm0, %v105_v29  ;;  %865 = vmatprep.subr.bf16.mxu1 %v902_v36 }
  0x59   :  { %842 = vmatpush3.bf16.msra.mxu0 %v1099_v40 }
  0x5a   :  { %843 = vmatprep.subr.bf16.mxu0 %v907_v34 }
  0x5d   :  { %844 = vmatpush3.bf16.msra.mxu0 %v907_v34 }
  0x5e   :  { %845 = vmatprep.subr.bf16.mxu0 %v908_v35 }
  0x5f   :  { %798 = vmatmul.mubr.msk.bf16.gmra.mxu0 %vm146_vm0, %v106_v32 }
  0x61   :  { %846 = vmatpush3.bf16.msra.mxu0 %v908_v35 }
 0x107   :  { %v787_v41 = vpop.f32.mrf.mxu0 }
 0x108   :  { %v214_v47 = vadd.f32 %v787_v41, %v1107_v43 }
 0x109   :  { %v205_v42 = vpop.f32.mrf.mxu0 }
 0x10a   :  { %v206_v45 = vadd.f32 %v1107_v43, %v205_v42  ;;  %v270_v54 = vmax.f32 %v214_v47, 0.0 }
 0x10b   :  { %v788_v44 = vpop.f32.mrf.mxu0 }
 0x10c   :  { %v217_v46 = vadd.f32 %v788_v44, %v1107_v43  ;;  %v268_v52 = vmax.f32 %v206_v45, 0.0 }
 0x10d   :  { %v208_v48 = vpop.f32.mrf.mxu0 }
 0x10e   :  { %v209_v49 = vadd.f32 %v1107_v43, %v208_v48  ;;  %v271_v50 = vmax.f32 %v217_v46, 0.0 }
 0x10f   :  { %v791_v51 = vpop.f32.mrf.mxu0 }
 0x110   :  { %v269_v53 = vmax.f32 %v209_v49, 0.0  ;;  %v230_v55 = vadd.f32 %v791_v51, %v1107_v43  ;;  %v285_v59 = vpack.c.bf16 %v271_v50, %v270_v54 }
 0x111   :  { %v221_v56 = vpop.f32.mrf.mxu0 }
 0x112   :  { %v222_v57 = vadd.f32 %v1107_v43, %v221_v56  ;;  %v284_v58 = vpack.c.bf16 %v269_v53, %v268_v52  ;;  %v274_v62 = vmax.f32 %v230_v55, 0.0 }
 0x113   :  { %v792_v60 = vpop.f32.mrf.mxu0 }
 0x114   :  { %v233_v61 = vadd.f32 %v792_v60, %v1107_v43  ;;  %817 = vmatprep.mubr.bf16.mxu1 %v284_v58  ;;  %v272_v0 = vmax.f32 %v222_v57, 0.0 }
 0x115   :  { %v224_v63 = vpop.f32.mrf.mxu0  ;;  %818 = vmatmul.mubr.bf16.vlgmr.msra.gmra.mxu1 %v285_v59 }
 0x116   :  { %v275_v1 = vmax.f32 %v233_v61, 0.0  ;;  %v225_v2 = vadd.f32 %v1107_v43, %v224_v63  ;;  %873 = vmatpush3.bf16.msra.mxu1 %v902_v36  ;;  %v909_v36 = vld [vmem:[#allocation8] sm:$0xff]  }
 0x117   :  { %v795_v3 = vpop.f32.mrf.mxu0  ;;  %866 = vmatprep.subr.bf16.mxu1 %v903_v37  ;;  %847 = vmatprep.subr.bf16.mxu0 %v909_v36 }
 0x118   :  { %v273_v4 = vmax.f32 %v225_v2, 0.0  ;;  %v287_v5 = vpack.c.bf16 %v275_v1, %v274_v62  ;;  %v246_v6 = vadd.f32 %v795_v3, %v1107_v43  ;;  %848 = vmatpush3.bf16.msra.mxu0 %v909_v36 }
 0x119   :  { %v237_v7 = vpop.f32.mrf.mxu0 }
 0x11a   :  { %v286_v8 = vpack.c.bf16 %v273_v4, %v272_v0  ;;  %v238_v9 = vadd.f32 %v1107_v43, %v237_v7  ;;  %874 = vmatpush3.bf16.msra.mxu1 %v903_v37  ;;  %v278_v12 = vmax.f32 %v246_v6, 0.0 }
 0x11b   :  { %v796_v10 = vpop.f32.mrf.mxu0  ;;  %867 = vmatprep.subr.bf16.mxu1 %v904_v38 }
 0x11c   :  { %v249_v11 = vadd.f32 %v796_v10, %v1107_v43  ;;  %821 = vmatprep.mubr.bf16.mxu1 %v286_v8  ;;  %v276_v14 = vmax.f32 %v238_v9, 0.0 }
 0x11d   :  { %v240_v13 = vpop.f32.mrf.mxu0  ;;  %822 = vmatmul.mubr.bf16.gmra.mxu1 %v287_v5 }
 0x11e   :  { %v279_v15 = vmax.f32 %v249_v11, 0.0  ;;  %v241_v16 = vadd.f32 %v1107_v43, %v240_v13  ;;  %875 = vmatpush3.bf16.msra.mxu1 %v904_v38 }
 0x11f   :  { %v799_v17 = vpop.f32.mrf.mxu0  ;;  %868 = vmatprep.subr.bf16.mxu1 %v1096_v39 }
 0x120   :  { %v277_v18 = vmax.f32 %v241_v16, 0.0  ;;  %v289_v19 = vpack.c.bf16 %v279_v15, %v278_v12  ;;  %v262_v20 = vadd.f32 %v799_v17, %v1107_v43 }
 0x121   :  { %v253_v21 = vpop.f32.mrf.mxu0 }
 0x122   :  { %v288_v22 = vpack.c.bf16 %v277_v18, %v276_v14  ;;  %v254_v23 = vadd.f32 %v1107_v43, %v253_v21  ;;  %876 = vmatpush3.bf16.msra.mxu1 %v1096_v39  ;;  %v282_v26 = vmax.f32 %v262_v20, 0.0  ;;  %v715_v39 = vld [vmem:[%s1142_s4] ss:$0 sm:$0xff] }
 0x123   :  { %v800_v24 = vpop.f32.mrf.mxu0  ;;  %869 = vmatprep.subr.bf16.mxu1 %v1099_v40 }
 0x124   :  { %825 = vmatprep.mubr.bf16.mxu1 %v288_v22  ;;  %v265_v25 = vadd.f32 %v800_v24, %v1107_v43  ;;  %v280_v28 = vmax.f32 %v254_v23, 0.0 }
 0x125   :  { %826 = vmatmul.mubr.bf16.gmra.mxu1 %v289_v19  ;;  %v256_v27 = vpop.f32.mrf.mxu0 }
 0x126   :  { %v283_v29 = vmax.f32 %v265_v25, 0.0  ;;  %v257_v30 = vadd.f32 %v1107_v43, %v256_v27  ;;  %877 = vmatpush3.bf16.msra.mxu1 %v1099_v40 }
 0x127   :  { %870 = vmatprep.subr.bf16.mxu1 %v907_v34 }
 0x128   :  { %v281_v31 = vmax.f32 %v257_v30, 0.0  ;;  %v291_v32 = vpack.c.bf16 %v283_v29, %v282_v26 }
 0x12a   :  { %v290_v33 = vpack.c.bf16 %v281_v31, %v280_v28  ;;  %878 = vmatpush3.bf16.msra.mxu1 %v907_v34  ;;  %v724_v31 = vld [vmem:[%s1144_s6] ss:$0 sm:$0xff]  ;;  %s1026_s6 = smov [#allocation10]  }
 0x12b   :  { %871 = vmatprep.subr.bf16.mxu1 %v908_v35  ;;  %s691_s26 = sshll.u32 %s1026_s6, 4  ;;  %s692_s26 = int_to_ptr.vmem [resolvable:$true] %s691_s26 }
 0x12c   :  { %829 = vmatprep.mubr.bf16.mxu1 %v290_v33  ;;  %s990_s27 = scalar_lea.vmem %s692_s26, 128  ;;  %p995_p7 = scmp.lt.s32.totalorder %s692_s26, %s692_s26 }
 0x12d   :  { %830 = vmatmul.mubr.bf16.gmra.mxu1 %v291_v32  ;;  %p991_p6 = scmp.ne.s32.totalorder %s692_s26, %s990_s27  ;;  %p996_p8 = scmp.lt.s32.totalorder %s990_s27, %s990_s27 }
 0x12e   :  { %879 = vmatpush3.bf16.msra.mxu1 %v908_v35 }
 0x12f   :  { %872 = vmatprep.subr.bf16.mxu1 %v909_v36  ;;  %p997_p9 = por %p996_p8, %p995_p7 }
 0x131   :  { %p998_p10 = pnand %p997_p9, %p991_p6 }
 0x132   :  { %880 = vmatpush3.bf16.msra.mxu1 %v909_v36 }
 0x1d5   :  { %v819_v37 = vpop.f32.mrf.mxu1 }
 0x1d6   :  { %v406_v43 = vadd.f32 %v819_v37, %v715_v39 }
 0x1d7   :  { %v397_v38 = vpop.f32.mrf.mxu1 }
 0x1d8   :  { %v398_v41 = vadd.f32 %v715_v39, %v397_v38  ;;  %v462_v50 = vmax.f32 %v406_v43, 0.0 }
 0x1d9   :  { %v820_v40 = vpop.f32.mrf.mxu1 }
 0x1da   :  { %v409_v42 = vadd.f32 %v820_v40, %v715_v39  ;;  %v460_v48 = vmax.f32 %v398_v41, 0.0 }
 0x1db   :  { %v400_v44 = vpop.f32.mrf.mxu1 }
 0x1dc   :  { %v401_v45 = vadd.f32 %v715_v39, %v400_v44  ;;  %v463_v46 = vmax.f32 %v409_v42, 0.0 }
 0x1dd   :  { %v823_v47 = vpop.f32.mrf.mxu1 }
 0x1de   :  { %v461_v49 = vmax.f32 %v401_v45, 0.0  ;;  %v477_v53 = vpack.c.bf16 %v463_v46, %v462_v50  ;;  %v422_v57 = vadd.f32 %v823_v47, %v715_v39 }
 0x1df   :  { %v413_v51 = vpop.f32.mrf.mxu1 }
 0x1e0   :  { %v476_v52 = vpack.c.bf16 %v461_v49, %v460_v48  ;;  %v414_v55 = vadd.f32 %v715_v39, %v413_v51  ;;  %v466_v0 = vmax.f32 %v422_v57, 0.0 }
 0x1e1   :  { %v824_v54 = vpop.f32.mrf.mxu1 }
 0x1e2   :  { %v425_v56 = vadd.f32 %v824_v54, %v715_v39  ;;  %849 = vmatprep.mubr.bf16.mxu0 %v476_v52  ;;  %v464_v62 = vmax.f32 %v414_v55, 0.0 }
 0x1e3   :  { %v416_v58 = vpop.f32.mrf.mxu1  ;;  %850 = vmatmul.mubr.bf16.vlgmr.msra.gmra.mxu0 %v477_v53 }
 0x1e4   :  { %v417_v59 = vadd.f32 %v715_v39, %v416_v58  ;;  %v467_v60 = vmax.f32 %v425_v56, 0.0 }
 0x1e5   :  { %v827_v61 = vpop.f32.mrf.mxu1 }
 0x1e6   :  { %v465_v63 = vmax.f32 %v417_v59, 0.0  ;;  %v438_v1 = vadd.f32 %v827_v61, %v715_v39  ;;  %v479_v5 = vpack.c.bf16 %v467_v60, %v466_v0 }
 0x1e7   :  { %v429_v2 = vpop.f32.mrf.mxu1 }
 0x1e8   :  { %v478_v3 = vpack.c.bf16 %v465_v63, %v464_v62  ;;  %v430_v4 = vadd.f32 %v715_v39, %v429_v2  ;;  %v470_v8 = vmax.f32 %v438_v1, 0.0 }
 0x1e9   :  { %v828_v6 = vpop.f32.mrf.mxu1 }
 0x1ea   :  { %v441_v7 = vadd.f32 %v828_v6, %v715_v39  ;;  %853 = vmatprep.mubr.bf16.mxu0 %v478_v3  ;;  %v468_v10 = vmax.f32 %v430_v4, 0.0 }
 0x1eb   :  { %v432_v9 = vpop.f32.mrf.mxu1  ;;  %854 = vmatmul.mubr.bf16.gmra.mxu0 %v479_v5 }
 0x1ec   :  { %v471_v11 = vmax.f32 %v441_v7, 0.0  ;;  %v433_v12 = vadd.f32 %v715_v39, %v432_v9 }
 0x1ed   :  { %v831_v13 = vpop.f32.mrf.mxu1 }
 0x1ee   :  { %v469_v14 = vmax.f32 %v433_v12, 0.0  ;;  %v481_v15 = vpack.c.bf16 %v471_v11, %v470_v8  ;;  %v454_v16 = vadd.f32 %v831_v13, %v715_v39 }
 0x1ef   :  { %v445_v17 = vpop.f32.mrf.mxu1 }
 0x1f0   :  { %v480_v18 = vpack.c.bf16 %v469_v14, %v468_v10  ;;  %v446_v19 = vadd.f32 %v715_v39, %v445_v17  ;;  %v474_v22 = vmax.f32 %v454_v16, 0.0 }
 0x1f1   :  { %v832_v20 = vpop.f32.mrf.mxu1 }
 0x1f2   :  { %857 = vmatprep.mubr.bf16.mxu0 %v480_v18  ;;  %v457_v21 = vadd.f32 %v832_v20, %v715_v39  ;;  %v472_v24 = vmax.f32 %v446_v19, 0.0 }
 0x1f3   :  { %858 = vmatmul.mubr.bf16.gmra.mxu0 %v481_v15  ;;  %v448_v23 = vpop.f32.mrf.mxu1 }
 0x1f4   :  { %v475_v25 = vmax.f32 %v457_v21, 0.0  ;;  %v449_v26 = vadd.f32 %v715_v39, %v448_v23 }
 0x1f6   :  { %v473_v27 = vmax.f32 %v449_v26, 0.0  ;;  %v483_v28 = vpack.c.bf16 %v475_v25, %v474_v22 }
 0x1f8   :  { %v482_v29 = vpack.c.bf16 %v473_v27, %v472_v24 }
 0x1fa   :  { %861 = vmatprep.mubr.bf16.mxu1 %v482_v29 }
 0x1fb   :  { %862 = vmatmul.mubr.bf16.vlgmr.msra.gmra.mxu1 %v483_v28 }
 0x2a3   :  { %v851_v30 = vpop.f32.mrf.mxu0 }
 0x2a4   :  { %v598_v38 = vadd.f32 %v851_v30, %v724_v31 }
 0x2a5   :  { %v589_v32 = vpop.f32.mrf.mxu0 }
 0x2a6   :  { %v590_v33 = vadd.f32 %v724_v31, %v589_v32 }
 0x2a7   :  { %v852_v34 = vpop.f32.mrf.mxu0 }
 0x2a8   :  { %652 = vxpose.xlu0.b32.start [1/16] (narrow) %v590_v33, 8  ;;  %v601_v40 = vadd.f32 %v852_v34, %v724_v31 }
 0x2a9   :  { %v592_v35 = vpop.f32.mrf.mxu0 }
 0x2aa   :  { %v593_v36 = vadd.f32 %v724_v31, %v592_v35 }
 0x2ab   :  { %v855_v37 = vpop.f32.mrf.mxu0 }
 0x2ac   :  { %653 = vxpose.xlu0.b32.cont [2/16] (narrow) %v593_v36, 8  ;;  %v614_v46 = vadd.f32 %v855_v37, %v724_v31 }
 0x2ad   :  { %v605_v39 = vpop.f32.mrf.mxu0 }
 0x2ae   :  { %v606_v42 = vadd.f32 %v724_v31, %v605_v39 }
 0x2af   :  { %v856_v41 = vpop.f32.mrf.mxu0 }
 0x2b0   :  { %654 = vxpose.xlu0.b32.cont [3/16] (narrow) %v598_v38, 8  ;;  %v617_v48 = vadd.f32 %v856_v41, %v724_v31 }
 0x2b1   :  { %v608_v43 = vpop.f32.mrf.mxu0 }
 0x2b2   :  { %v609_v44 = vadd.f32 %v724_v31, %v608_v43 }
 0x2b3   :  { %v859_v45 = vpop.f32.mrf.mxu0 }
 0x2b4   :  { %655 = vxpose.xlu0.b32.cont [4/16] (narrow) %v601_v40, 8  ;;  %v630_v54 = vadd.f32 %v859_v45, %v724_v31 }
 0x2b5   :  { %v621_v47 = vpop.f32.mrf.mxu0 }
 0x2b6   :  { %v622_v50 = vadd.f32 %v724_v31, %v621_v47 }
 0x2b7   :  { %v860_v49 = vpop.f32.mrf.mxu0 }
 0x2b8   :  { %656 = vxpose.xlu0.b32.cont [5/16] (narrow) %v606_v42, 8  ;;  %v633_v56 = vadd.f32 %v860_v49, %v724_v31 }
 0x2b9   :  { %v624_v51 = vpop.f32.mrf.mxu0 }
 0x2ba   :  { %v625_v52 = vadd.f32 %v724_v31, %v624_v51 }
 0x2bb   :  { %v863_v53 = vpop.f32.mrf.mxu1 }
 0x2bc   :  { %657 = vxpose.xlu0.b32.cont [6/16] (narrow) %v609_v44, 8  ;;  %v646_v61 = vadd.f32 %v863_v53, %v724_v31 }
 0x2bd   :  { %v637_v55 = vpop.f32.mrf.mxu1 }
 0x2be   :  { %v638_v58 = vadd.f32 %v724_v31, %v637_v55 }
 0x2bf   :  { %v864_v57 = vpop.f32.mrf.mxu1 }
 0x2c0   :  { %658 = vxpose.xlu0.b32.cont [7/16] (narrow) %v614_v46, 8  ;;  %v649_v62 = vadd.f32 %v864_v57, %v724_v31 }
 0x2c1   :  { %v640_v59 = vpop.f32.mrf.mxu1 }
 0x2c2   :  { %v641_v60 = vadd.f32 %v724_v31, %v640_v59 }
 0x2c4   :  { %659 = vxpose.xlu0.b32.cont [8/16] (narrow) %v617_v48, 8 }
 0x2c8   :  { %660 = vxpose.xlu0.b32.cont [9/16] (narrow) %v622_v50, 8 }
 0x2cc   :  { %661 = vxpose.xlu0.b32.cont [10/16] (narrow) %v625_v52, 8 }
 0x2d0   :  { %662 = vxpose.xlu0.b32.cont [11/16] (narrow) %v630_v54, 8 }
 0x2d4   :  { %663 = vxpose.xlu0.b32.cont [12/16] (narrow) %v633_v56, 8 }
 0x2d8   :  { %664 = vxpose.xlu0.b32.cont [13/16] (narrow) %v638_v58, 8 }
 0x2dc   :  { %665 = vxpose.xlu0.b32.cont [14/16] (narrow) %v641_v60, 8 }
 0x2e0   :  { %666 = vxpose.xlu0.b32.cont [15/16] (narrow) %v646_v61, 8 }
 0x2e4   :  { %667 = vxpose.xlu0.b32.end [16/16] (narrow) %v649_v62, 8 }
 0x324   :  { %v668_v63 = vpop.trf.xlu0 }
 0x325   :  { %684 = vst [vmem:[#allocation10] sm:$0xff] %v668_v63 }
 0x326   :  { %1001 = shalt.err (!%p998_p10)
}
 0x327   :  { %694 = dma.vmem_to_hbm [thread:$0]  %s692_s26, 128, %s1145_s7, [#allocation4]  }
 0x328   :  { %1016 = dma.done.wait [#allocation4], 128  }
 0x329   :  { %1017 = vsyncadd [#allocation4], 4294967168 }
 0x32a   :  { %698 = vsyncpa [#allocation3], 1 }
 0x32b   :  { %699 = vsyncpa [#allocation6], 1 }
 0x32c   :  { %700 = vsyncpa [#allocation9], 1 }
 0x32d   :  { %701 = vsyncpa [#allocation4], 1 }

</bundles_post_ra>
